<compile_context>
chip_gen: v7x
topology: tpu7x:2x2x1
jax: 0.10.0
libtpu: 0.0.40
codegen_flags: <defaults>
</compile_context>

<pallas_src>
import jax
import jax.numpy as jnp
from jax.experimental import pallas as pl
from jax.experimental.pallas import tpu as pltpu


def _awl_kernel(l_ref, p_ref, out_ref):
    """l_ref, p_ref: (1, num) f32 VMEM blocks (full arrays).
    out_ref: (1, 1) f32 in SMEM — summed weighted loss."""
    l = l_ref[...]                      # (1, num) task losses
    p = p_ref[...]                      # (1, num) learnable params
    p2 = p * p
    # Exact division to match PyTorch `0.5 / params[i]**2 * loss`.
    # NOTE: if a param drifts to 0 during training this is inf, same as the
    # PyTorch original (no clamp added to preserve semantics).
    term = 0.5 * l / p2 + jnp.log(1.0 + p2)
    out_ref[0, 0] = jnp.sum(term)


def _awl_pallas(losses, params):
    num = losses.shape[0]
    # (num,) -> (1, num) is a metadata-only reshape (no HBM copy), and the
    # (1, num) block equals the full array so the (8,128) rule is satisfied.
    losses2d = losses.astype(jnp.float32).reshape(1, num)
    params2d = params.astype(jnp.float32).reshape(1, num)

    out = pl.pallas_call(
        _awl_kernel,
        out_shape=jax.ShapeDtypeStruct((1, 1), jnp.float32),
        in_specs=[
            pl.BlockSpec((1, num), lambda: (0, 0)),
            pl.BlockSpec((1, num), lambda: (0, 0)),
        ],
        out_specs=pl.BlockSpec(memory_space=pltpu.MemorySpace.SMEM),
        cost_estimate=pl.CostEstimate(
            flops=6 * num, transcendentals=num, bytes_accessed=8 * num + 4
        ),
    )(losses2d, params2d)
    return out[0, 0]


# params are a trainable nn.Parameter in the original module, so the Pallas
# forward needs a VJP.  Analytic gradients in plain jnp (cheap, fuses into the
# backward pass):  d/dl_i = 0.5/p_i^2,   d/dp_i = -l_i/p_i^3 + 2 p_i/(1+p_i^2).
@jax.custom_vjp
def awl_loss_sum(losses, params):
    return _awl_pallas(losses, params)


def _awl_fwd(losses, params):
    return _awl_pallas(losses, params), (losses, params)


def _awl_bwd(res, g):
    losses, params = res
    p2 = params * params
    d_losses = g * (0.5 / p2)
    d_params = g * (-losses / (params * p2) + 2.0 * params / (1.0 + p2))
    return d_losses.astype(losses.dtype), d_params.astype(params.dtype)


awl_loss_sum.defvjp(_awl_fwd, _awl_bwd)


@jax.jit
def automatic_weighted_loss_liebel(losses, params):
    """losses: (num,) scalar task losses; params: (num,) learnable weights.

    Returns (loss_sum, params) entirely on-device — matches the PyTorch forward;
    the per-element `.item()` conversion is a logging concern outside this path.
    """
    return awl_loss_sum(losses, params), params


if __name__ == "__main__":
    num = 2
    key = jax.random.PRNGKey(0)
    # Synthetic scalar task losses (deterministic).
    losses = jax.random.uniform(key, (num,), dtype=jnp.float32, minval=0.5, maxval=3.0)
    # Parameters initialized exactly as in __init__: torch.ones(num).
    params = jnp.ones((num,), dtype=jnp.float32)

    loss_sum, params_out = automatic_weighted_loss_liebel(losses, params)
    loss_sum = jax.block_until_ready(loss_sum)

    # Pure-JAX reference check (mirrors the PyTorch forward).
    def ref_fn(l, p):
        p2 = p * p
        return jnp.sum(0.5 / p2 * l + jnp.log(1.0 + p2))

    ref = ref_fn(losses, params)
    assert jnp.allclose(loss_sum, ref, rtol=1e-5, atol=1e-5), (loss_sum, ref)

    # Also check at non-unit params (exercises the exact-division path).
    params2 = jnp.array([0.7, 1.9], dtype=jnp.float32)
    loss_sum2, _ = automatic_weighted_loss_liebel(losses, params2)
    assert jnp.allclose(jax.block_until_ready(loss_sum2), ref_fn(losses, params2),
                        rtol=1e-5, atol=1e-5)

    # Gradient check: custom_vjp vs. pure-JAX autodiff reference.
    g_kernel = jax.jit(jax.grad(awl_loss_sum, argnums=(0, 1)))(losses, params2)
    g_ref = jax.grad(ref_fn, argnums=(0, 1))(losses, params2)
    for gk, gr in zip(g_kernel, g_ref):
        assert jnp.allclose(gk, gr, rtol=1e-5, atol=1e-5), (gk, gr)

    # Host conversion only at "logging time", outside the jitted compute path.
    params_list = [float(v) for v in jax.device_get(params_out)]
    assert params_list == [1.0] * num

    print("KERNEL_OK")
</pallas_src>

<mosaic_0001>
module attributes {stable_mosaic.version = 11 : i64} {
  func.func @_awl_kernel(%arg0: memref<1x2xf32, #tpu.memory_space<vmem>>, %arg1: memref<1x2xf32, #tpu.memory_space<vmem>>, %arg2: memref<1x1xf32, #tpu.memory_space<smem>>) attributes {dimension_semantics = [], scalar_prefetch = 0 : i64, scratch_operands = 0 : i64, tpu.core_type = #tpu.core_type<tc>} {
    %c0 = arith.constant 0 : index
    %c0_0 = arith.constant 0 : index
    %0 = vector.load %arg0[%c0, %c0_0] : memref<1x2xf32, #tpu.memory_space<vmem>>, vector<1x2xf32>
    %c0_1 = arith.constant 0 : index
    %c0_2 = arith.constant 0 : index
    %1 = vector.load %arg1[%c0_1, %c0_2] : memref<1x2xf32, #tpu.memory_space<vmem>>, vector<1x2xf32>
    %2 = arith.mulf %1, %1 : vector<1x2xf32>
    %cst = arith.constant 5.000000e-01 : f32
    %3 = vector.broadcast %cst : f32 to vector<1x2xf32>
    %4 = arith.mulf %3, %0 : vector<1x2xf32>
    %5 = arith.divf %4, %2 : vector<1x2xf32>
    %cst_3 = arith.constant 1.000000e+00 : f32
    %6 = vector.broadcast %cst_3 : f32 to vector<1x2xf32>
    %7 = arith.addf %6, %2 : vector<1x2xf32>
    %8 = math.log %7 : vector<1x2xf32>
    %9 = arith.addf %5, %8 : vector<1x2xf32>
    %10 = vector.shape_cast %9 : vector<1x2xf32> to vector<1x1x2xf32>
    %cst_4 = arith.constant dense<0.000000e+00> : vector<1xf32>
    %11 = vector.multi_reduction <add>, %10, %cst_4 [1, 2] : vector<1x1x2xf32> to vector<1xf32>
    %12 = vector.shape_cast %11 : vector<1xf32> to vector<1x1x1xf32>
    %13 = vector.extract %12[0, 0, 0] : f32 from vector<1x1x1xf32>
    %c0_5 = arith.constant 0 : index
    %c0_6 = arith.constant 0 : index
    %14 = memref.load %arg2[%c0_5, %c0_6] : memref<1x1xf32, #tpu.memory_space<smem>>
    memref.store %13, %arg2[%c0_5, %c0_6] : memref<1x1xf32, #tpu.memory_space<smem>>
    return
  }
}

</mosaic_0001>

<bundles_post_ra>
// kernel: automatic_weighted_loss_liebel.1
= control target key start
LH: loop header
LB: loop body
LE: loop exit
PB: predicated region body
PF: predicated region fallthrough
CT: control target
= control target key end

     0   :  { %s101_s0 = inlined_call_operand.vmem [shape: f32[1,2], index: 0, kind: input, shape index: {}]   ;;  %s102_s1 = inlined_call_operand.vmem [shape: f32[1,2], index: 1, kind: input, shape index: {}]   ;;  %s103_s2 = inlined_call_operand.hbm [shape: f32[1,1], index: 2, kind: output, shape index: {}]  }
   0x1   :  { %v13_v0 = vld [vmem:[%s102_s1] sm:$0x1] }
   0x2   :  { %v14_v1 = vmul.f32 %v13_v0, %v13_v0 }
   0x3   :  { %7 = vsyncpa [#allocation3], 0  ;;  %v12_v3 = vld [vmem:[%s101_s0] sm:$0x1]  ;;  %vm22_vm0 = vcmask 8192   ;;  %s55_s14 = scalar_lea.hbm %s103_s2, 16 }
   0x4   :  { %51 = vrcp.f32 %v14_v1  ;;  %v18_v2 = vadd.f32 1.0, %v14_v1  ;;  %v15_v4 = vmul.f32 0.5, %v12_v3  ;;  %p56_p0 = scmp.ne.s32.totalorder %s103_s2, %s55_s14  ;;  %p59_p1 = scmp.lt.u32.totalorder %s55_s14, %s103_s2 }
   0x6   :  { %53 = vlog2.f32 %v18_v2  ;;  %p61_p2 = pnand %p59_p1, %p56_p0 }
   0xe   :  { %v52_v5 = vpop.eup %51 }
   0xf   :  { %v17_v6 = vmul.f32 %v52_v5, %v15_v4 }
  0x10   :  { %v54_v7 = vpop.eup %53 }
  0x11   :  { %v20_v8 = vmul.f32 0.6931472, %v54_v7 }
  0x13   :  { %v21_v9 = vadd.f32 %v20_v8, %v17_v6 }
  0x15   :  { %v23_v10 = vsel %vm22_vm0, %v21_v9, 0.0 }
  0x16   :  { %24 = vadd.xlane.f32.xlu0 %v23_v10 }
  0xa3   :  { %v25_v11 = vpop.xlane.xlu0 %24 }
  0xa4   :  { %v26_v12 = vrot.slane %v25_v11, 4 }
  0xa6   :  { %v27_v13 = vadd.f32 %v26_v12, %v25_v11 }
  0xa8   :  { %v28_v14 = vrot.slane %v27_v13, 2 }
  0xaa   :  { %v29_v15 = vadd.f32 %v28_v14, %v27_v13 }
  0xac   :  { %v30_v16 = vrot.slane %v29_v15, 1 }
  0xae   :  { %v31_v17 = vadd.f32 %v30_v16, %v29_v15 }
  0xb0   :  { %48 = vpush %v31_v17 }
  0xe1   :  { %s49_s1 = spop %48 }
  0xe2   :  { %34 = sst [smem:[#allocation2]] %s49_s1 }
  0xe3   :  { %64 = shalt.err (!%p61_p2)
}
  0xe4   :  { %s67_s19 = smov [#allocation2]  }
  0xe5   :  { %42 = dma.smem_to_hbm %s67_s19, 16, %s103_s2, [#allocation3]  }
  0xe6   :  { %65 = dma.done.wait [#allocation3], 16  }
  0xe7   :  { %66 = vsyncadd [#allocation3], 4294967280 }
  0xe8   :  { %46 = sfence }
  0xe9   :  { %47 = vsyncpa [#allocation3], 1 }

</bundles_post_ra>
